<compile_context>
chip_gen: v7x
topology: tpu7x:2x2x1
jax: 0.10.0
libtpu: 0.0.40
codegen_flags: <defaults>
</compile_context>

<pallas_src>
import math

import jax
import jax.numpy as jnp
from jax import lax
from jax.experimental import pallas as pl
from jax.experimental.pallas import tpu as pltpu

INV_SQRT2 = 1.0 / math.sqrt(2.0)


def _erf_poly(z):
    # Abramowitz & Stegun 7.1.26, max abs error ~1.5e-7.
    # TODO(synk): lax.erf has no guaranteed Mosaic lowering; use a polynomial erf.
    a1, a2, a3, a4, a5 = 0.254829592, -0.284496736, 1.421413741, -1.453152027, 1.061405429
    p = 0.3275911
    sign = jnp.where(z >= 0.0, 1.0, -1.0)
    za = jnp.abs(z)
    t = 1.0 / (1.0 + p * za)
    poly = ((((a5 * t + a4) * t + a3) * t + a2) * t + a1) * t
    return sign * (1.0 - poly * jnp.exp(-za * za))


def _gelu_exact(x):
    # nn.GELU() default = exact (erf) GELU.
    return 0.5 * x * (1.0 + _erf_poly(x * INV_SQRT2))


def _wavelet_refinement_kernel(xr_ref, xc_ref, q_ref, gamma_ref, beta_ref,
                               w1t_ref, b1_ref, w2t_ref, b2_ref, out_ref):
    tb, L, Dh = out_ref.shape

    # ---- gating MLP: LayerNorm -> Linear -> GELU -> Linear -> Sigmoid ------------
    q = q_ref[...].astype(jnp.float32)                          # (tb, Dh)
    mu = jnp.mean(q, axis=-1, keepdims=True)
    var = jnp.mean((q - mu) ** 2, axis=-1, keepdims=True)       # biased var (torch LN)
    qn = (q - mu) * lax.rsqrt(var + 1e-5) * gamma_ref[...] + beta_ref[...]
    mlp_dt = w1t_ref.dtype                                      # bf16 in bf16 models
    h = jnp.dot(qn.astype(mlp_dt), w1t_ref[...],
                preferred_element_type=jnp.float32) + b1_ref[...]
    h = _gelu_exact(h)
    h = jnp.dot(h.astype(mlp_dt), w2t_ref[...],
                preferred_element_type=jnp.float32) + b2_ref[...]
    gate = jax.nn.sigmoid(h)[:, None, :]                        # (tb, 1, Dh), in vregs

    # ---- collapsed Haar analysis -> gate -> synthesis ----------------------------
    # With s = 1/sqrt(2), 2*s*s == 1 and the same gate scales both subbands:
    #     rec[m] = g * (xw[m-1] + xw[m]·[m <= L-2]),   xw[-1] := 0        (odd L)
    # Zeroing the tail row of xw handles BOTH boundaries (the dropped odd sample at
    # m = L-1 and the wrapped-in row for m = 0) with a single select.
    xw = jnp.swapaxes(xc_ref[...], 1, 2).astype(jnp.float32)    # (tb, L, Dh) wavelet view
    keep = lax.broadcasted_iota(jnp.int32, (1, L, Dh), 1) < (L - 1)
    xw = jnp.where(keep, xw, 0.0)
    rec = gate * (jnp.roll(xw, 1, axis=1) + xw)                 # roll = one shifted copy

    out_ref[...] = (xr_ref[...].astype(jnp.float32) + rec).astype(out_ref.dtype)


def wavelet_refinement(x, global_q, params, *, block_rows=None):
    """x: (B, H, L, Dh), global_q: (B, H, Dh) -> (B, H, L, Dh).  L must be odd."""
    B, H, L, Dh = x.shape
    assert L % 2 == 1, "original module is only shape-consistent for odd L"
    BH = B * H

    # Both kernel views of x are raw row-major reshapes (free bitcasts, no HBM pass).
    xr = x.reshape(BH, L, Dh)        # natural view: residual add / output layout
    xc = x.reshape(BH, Dh, L)        # module's scrambled wavelet view
    q = global_q.reshape(BH, Dh)

    mlp_dtype = jnp.bfloat16 if x.dtype == jnp.bfloat16 else jnp.float32
    gamma = params["gamma"].reshape(1, Dh).astype(jnp.float32)
    beta = params["beta"].reshape(1, Dh).astype(jnp.float32)
    w1t = params["w1"].T.astype(mlp_dtype)     # PyTorch Linear stores (out, in)
    w2t = params["w2"].T.astype(mlp_dtype)
    b1 = params["b1"].reshape(1, Dh).astype(jnp.float32)
    b2 = params["b2"].reshape(1, Dh).astype(jnp.float32)

    # Rows per grid step.  Per-row VMEM ≈ double-buffered streams (xr, xc, out at the
    # model dtype) + ~5 live f32 full-tile temporaries in the body (xw, masked xw,
    # rolled, rec/sum, xr cast).  Target ~24 MiB working set (fits v7x's 32 MiB default
    # scope with headroom) and set vmem_limit_bytes explicitly so v5e's 16 MiB default
    # scoped limit never bites.
    esize = x.dtype.itemsize
    row_bytes = 2 * 3 * L * Dh * esize + 5 * L * Dh * 4
    if block_rows is None:
        budget = 24 << 20
        block_rows = max(1, budget // row_bytes)
    tb = int(min(BH, block_rows, 1024))        # 512-1024 rows ≈ HBM-roofline regime (v6e)
    if BH >= 16:
        tb = min(tb, (BH + 1) // 2)            # >=2 grid steps -> both v7x TCs get work
    if tb < BH:
        tb = min(BH, max(8, (tb // 8) * 8))    # sublane-aligned row blocks
    grid = (pl.cdiv(BH, tb),)

    cost = pl.CostEstimate(
        flops=4 * BH * Dh * Dh + 4 * BH * L * Dh,
        transcendentals=2 * BH * Dh,
        bytes_accessed=3 * BH * L * Dh * esize + BH * Dh * esize + 2 * Dh * Dh * 4,
    )

    out = pl.pallas_call(
        _wavelet_refinement_kernel,
        out_shape=jax.ShapeDtypeStruct((BH, L, Dh), x.dtype),
        grid=grid,
        in_specs=[
            pl.BlockSpec((tb, L, Dh), lambda i: (i, 0, 0)),   # x, natural view
            pl.BlockSpec((tb, Dh, L), lambda i: (i, 0, 0)),   # x, scrambled wavelet view
            pl.BlockSpec((tb, Dh), lambda i: (i, 0)),         # global_q rows
            pl.BlockSpec((1, Dh), lambda i: (0, 0)),          # LN gamma  (resident)
            pl.BlockSpec((1, Dh), lambda i: (0, 0)),          # LN beta
            pl.BlockSpec((Dh, Dh), lambda i: (0, 0)),         # W1^T
            pl.BlockSpec((1, Dh), lambda i: (0, 0)),          # b1
            pl.BlockSpec((Dh, Dh), lambda i: (0, 0)),         # W2^T
            pl.BlockSpec((1, Dh), lambda i: (0, 0)),          # b2
        ],
        out_specs=pl.BlockSpec((tb, L, Dh), lambda i: (i, 0, 0)),
        compiler_params=pltpu.CompilerParams(
            dimension_semantics=("parallel",),
            vmem_limit_bytes=48 << 20),
        cost_estimate=cost,
    )(xr, xc, q, gamma, beta, w1t, b1, w2t, b2)

    return out.reshape(B, H, L, Dh)


def init_params(key, d_model, skip_init=0.9):
    ks = jax.random.split(key, 6)
    scale = 1.0 / math.sqrt(d_model)
    return {
        "gamma": jnp.ones((d_model,), jnp.float32)
                 + 0.01 * jax.random.normal(ks[0], (d_model,), jnp.float32),
        "beta": 0.01 * jax.random.normal(ks[1], (d_model,), jnp.float32),
        "w1": scale * jax.random.normal(ks[2], (d_model, d_model), jnp.float32),
        "b1": 0.1 * jax.random.normal(ks[3], (d_model,), jnp.float32),
        "w2": scale * jax.random.normal(ks[4], (d_model, d_model), jnp.float32),
        "b2": 0.1 * jax.random.normal(ks[5], (d_model,), jnp.float32),
        # unused at inference (skip branch never taken in eval mode)
        "skip_logit": jnp.float32(math.log((1.0 - skip_init) / skip_init)),
    }


def _reference(x, gq, params):
    """Pure-JAX transcription of the PyTorch forward (eval mode)."""
    B, H, L, Dh = x.shape
    M = L // 2
    s = INV_SQRT2
    xc = x.reshape(B * H, Dh, L)
    low = xc[..., 0:2 * M:2] * s + xc[..., 1:2 * M:2] * s
    high = xc[..., 0:2 * M:2] * (-s) + xc[..., 1:2 * M:2] * s
    q = gq.reshape(B * H, Dh)
    mu = q.mean(-1, keepdims=True)
    var = ((q - mu) ** 2).mean(-1, keepdims=True)
    qn = (q - mu) / jnp.sqrt(var + 1e-5) * params["gamma"] + params["beta"]
    h = qn @ params["w1"].T + params["b1"]
    h = jax.nn.gelu(h, approximate=False)
    h = h @ params["w2"].T + params["b2"]
    g = jax.nn.sigmoid(h)[:, :, None]
    lg, hg = low * g, high * g
    up_lp = jnp.pad(jnp.repeat(lg, 2, axis=-1), ((0, 0), (0, 0), (1, 1)))
    up_hp = jnp.pad(jnp.repeat(hg, 2, axis=-1), ((0, 0), (0, 0), (1, 1)))
    rec_lp = (up_lp[..., :-1] + up_lp[..., 1:]) * s
    rec_hp = (up_hp[..., :-1] - up_hp[..., 1:]) * s
    recon = (rec_lp + rec_hp).reshape(B, H, Dh, L).transpose(0, 1, 3, 2)
    return x + recon


if __name__ == "__main__":
    B, H, L, Dh = 2, 2, 17, 32   # L odd: required for the module's reshape to be valid
    key = jax.random.PRNGKey(0)
    kx, kq, kp = jax.random.split(key, 3)
    x = jax.random.normal(kx, (B, H, L, Dh), jnp.float32)
    global_q = jax.random.normal(kq, (B, H, Dh), jnp.float32)
    params = init_params(kp, Dh)

    out = wavelet_refinement(x, global_q, params)
    out = jax.block_until_ready(out)

    ref = _reference(x, global_q, params)
    assert out.shape == (B, H, L, Dh)
    max_err = float(jnp.max(jnp.abs(out - ref)))
    assert max_err < 1e-4, f"kernel/reference mismatch: {max_err}"
    print("KERNEL_OK")
</pallas_src>

<mosaic_0001>
module attributes {stable_mosaic.version = 11 : i64} {
  func.func @_wavelet_refinement_kernel(%arg0: i32, %arg1: memref<4x17x32xf32, #tpu.memory_space<vmem>>, %arg2: memref<4x32x17xf32, #tpu.memory_space<vmem>>, %arg3: memref<4x32xf32, #tpu.memory_space<vmem>>, %arg4: memref<1x32xf32, #tpu.memory_space<vmem>>, %arg5: memref<1x32xf32, #tpu.memory_space<vmem>>, %arg6: memref<32x32xf32, #tpu.memory_space<vmem>>, %arg7: memref<1x32xf32, #tpu.memory_space<vmem>>, %arg8: memref<32x32xf32, #tpu.memory_space<vmem>>, %arg9: memref<1x32xf32, #tpu.memory_space<vmem>>, %arg10: memref<4x17x32xf32, #tpu.memory_space<vmem>>) attributes {dimension_semantics = [#tpu.dimension_semantics<parallel>], iteration_bounds = array<i64: 1>, scalar_prefetch = 0 : i64, scratch_operands = 0 : i64, tpu.core_type = #tpu.core_type<tc>, window_params = [{transform_indices = @transform_0, window_bounds = array<i64: 4, 17, 32>}, {transform_indices = @transform_1, window_bounds = array<i64: 4, 32, 17>}, {transform_indices = @transform_2, window_bounds = array<i64: 4, 32>}, {pipeline_mode = #tpu.pipeline_mode<synchronous>, transform_indices = @transform_3, window_bounds = array<i64: 1, 32>}, {pipeline_mode = #tpu.pipeline_mode<synchronous>, transform_indices = @transform_4, window_bounds = array<i64: 1, 32>}, {pipeline_mode = #tpu.pipeline_mode<synchronous>, transform_indices = @transform_5, window_bounds = array<i64: 32, 32>}, {pipeline_mode = #tpu.pipeline_mode<synchronous>, transform_indices = @transform_6, window_bounds = array<i64: 1, 32>}, {pipeline_mode = #tpu.pipeline_mode<synchronous>, transform_indices = @transform_7, window_bounds = array<i64: 32, 32>}, {pipeline_mode = #tpu.pipeline_mode<synchronous>, transform_indices = @transform_8, window_bounds = array<i64: 1, 32>}, {transform_indices = @transform_9, window_bounds = array<i64: 4, 17, 32>}]} {
    %c0 = arith.constant 0 : index
    %c0_0 = arith.constant 0 : index
    %0 = vector.load %arg3[%c0, %c0_0] : memref<4x32xf32, #tpu.memory_space<vmem>>, vector<4x32xf32>
    %cst = arith.constant dense<0.000000e+00> : vector<4xf32>
    %1 = vector.multi_reduction <add>, %0, %cst [1] : vector<4x32xf32> to vector<4xf32>
    %2 = vector.shape_cast %1 : vector<4xf32> to vector<4x1xf32>
    %cst_1 = arith.constant 3.200000e+01 : f32
    %3 = vector.broadcast %cst_1 : f32 to vector<4x1xf32>
    %4 = arith.divf %2, %3 : vector<4x1xf32>
    %5 = vector.broadcast %4 : vector<4x1xf32> to vector<4x32xf32>
    %6 = arith.subf %0, %5 : vector<4x32xf32>
    %7 = arith.mulf %6, %6 : vector<4x32xf32>
    %cst_2 = arith.constant dense<0.000000e+00> : vector<4xf32>
    %8 = vector.multi_reduction <add>, %7, %cst_2 [1] : vector<4x32xf32> to vector<4xf32>
    %9 = vector.shape_cast %8 : vector<4xf32> to vector<4x1xf32>
    %cst_3 = arith.constant 3.200000e+01 : f32
    %10 = vector.broadcast %cst_3 : f32 to vector<4x1xf32>
    %11 = arith.divf %9, %10 : vector<4x1xf32>
    %12 = vector.broadcast %4 : vector<4x1xf32> to vector<4x32xf32>
    %13 = arith.subf %0, %12 : vector<4x32xf32>
    %cst_4 = arith.constant 9.99999974E-6 : f32
    %14 = vector.broadcast %cst_4 : f32 to vector<4x1xf32>
    %15 = arith.addf %11, %14 : vector<4x1xf32>
    %16 = math.rsqrt %15 : vector<4x1xf32>
    %17 = vector.broadcast %16 : vector<4x1xf32> to vector<4x32xf32>
    %18 = arith.mulf %13, %17 : vector<4x32xf32>
    %c0_5 = arith.constant 0 : index
    %c0_6 = arith.constant 0 : index
    %19 = vector.load %arg4[%c0_5, %c0_6] : memref<1x32xf32, #tpu.memory_space<vmem>>, vector<1x32xf32>
    %20 = vector.broadcast %19 : vector<1x32xf32> to vector<4x32xf32>
    %21 = arith.mulf %18, %20 : vector<4x32xf32>
    %c0_7 = arith.constant 0 : index
    %c0_8 = arith.constant 0 : index
    %22 = vector.load %arg5[%c0_7, %c0_8] : memref<1x32xf32, #tpu.memory_space<vmem>>, vector<1x32xf32>
    %23 = vector.broadcast %22 : vector<1x32xf32> to vector<4x32xf32>
    %24 = arith.addf %21, %23 : vector<4x32xf32>
    %c0_9 = arith.constant 0 : index
    %c0_10 = arith.constant 0 : index
    %25 = vector.load %arg6[%c0_9, %c0_10] : memref<32x32xf32, #tpu.memory_space<vmem>>, vector<32x32xf32>
    %cst_11 = arith.constant dense<0.000000e+00> : vector<4x32xf32>
    %26 = tpu.matmul %24, %25, %cst_11 {dimension_numbers = #tpu.dot_dimension_numbers<[1], [0], [0], [1], [0, 0, 1, 1], [], []>} : vector<4x32xf32>, vector<32x32xf32>, vector<4x32xf32> -> vector<4x32xf32>
    %c0_12 = arith.constant 0 : index
    %c0_13 = arith.constant 0 : index
    %27 = vector.load %arg7[%c0_12, %c0_13] : memref<1x32xf32, #tpu.memory_space<vmem>>, vector<1x32xf32>
    %28 = vector.broadcast %27 : vector<1x32xf32> to vector<4x32xf32>
    %29 = arith.addf %26, %28 : vector<4x32xf32>
    %cst_14 = arith.constant 5.000000e-01 : f32
    %30 = vector.broadcast %cst_14 : f32 to vector<4x32xf32>
    %31 = arith.mulf %30, %29 : vector<4x32xf32>
    %cst_15 = arith.constant 0.707106769 : f32
    %32 = vector.broadcast %cst_15 : f32 to vector<4x32xf32>
    %33 = arith.mulf %29, %32 : vector<4x32xf32>
    %cst_16 = arith.constant 0.000000e+00 : f32
    %34 = vector.broadcast %cst_16 : f32 to vector<4x32xf32>
    %35 = arith.cmpf oge, %33, %34 : vector<4x32xf32>
    %cst_17 = arith.constant 1.000000e+00 : f32
    %cst_18 = arith.constant -1.000000e+00 : f32
    %36 = vector.broadcast %cst_17 : f32 to vector<4x32xf32>
    %37 = vector.broadcast %cst_18 : f32 to vector<4x32xf32>
    %38 = arith.select %35, %36, %37 : vector<4x32xi1>, vector<4x32xf32>
    %39 = math.absf %33 : vector<4x32xf32>
    %cst_19 = arith.constant 0.327591091 : f32
    %40 = vector.broadcast %cst_19 : f32 to vector<4x32xf32>
    %41 = arith.mulf %40, %39 : vector<4x32xf32>
    %cst_20 = arith.constant 1.000000e+00 : f32
    %42 = vector.broadcast %cst_20 : f32 to vector<4x32xf32>
    %43 = arith.addf %42, %41 : vector<4x32xf32>
    %cst_21 = arith.constant 1.000000e+00 : f32
    %44 = vector.broadcast %cst_21 : f32 to vector<4x32xf32>
    %45 = arith.divf %44, %43 : vector<4x32xf32>
    %cst_22 = arith.constant 1.06140542 : f32
    %46 = vector.broadcast %cst_22 : f32 to vector<4x32xf32>
    %47 = arith.mulf %46, %45 : vector<4x32xf32>
    %cst_23 = arith.constant -1.45315206 : f32
    %48 = vector.broadcast %cst_23 : f32 to vector<4x32xf32>
    %49 = arith.addf %47, %48 : vector<4x32xf32>
    %50 = arith.mulf %49, %45 : vector<4x32xf32>
    %cst_24 = arith.constant 1.42141378 : f32
    %51 = vector.broadcast %cst_24 : f32 to vector<4x32xf32>
    %52 = arith.addf %50, %51 : vector<4x32xf32>
    %53 = arith.mulf %52, %45 : vector<4x32xf32>
    %cst_25 = arith.constant -0.284496725 : f32
    %54 = vector.broadcast %cst_25 : f32 to vector<4x32xf32>
    %55 = arith.addf %53, %54 : vector<4x32xf32>
    %56 = arith.mulf %55, %45 : vector<4x32xf32>
    %cst_26 = arith.constant 0.254829586 : f32
    %57 = vector.broadcast %cst_26 : f32 to vector<4x32xf32>
    %58 = arith.addf %56, %57 : vector<4x32xf32>
    %59 = arith.mulf %58, %45 : vector<4x32xf32>
    %cst_27 = arith.constant 0.000000e+00 : f32
    %60 = vector.broadcast %cst_27 : f32 to vector<4x32xf32>
    %61 = arith.subf %60, %39 : vector<4x32xf32>
    %62 = arith.mulf %61, %39 : vector<4x32xf32>
    %63 = math.exp %62 : vector<4x32xf32>
    %64 = arith.mulf %59, %63 : vector<4x32xf32>
    %cst_28 = arith.constant 1.000000e+00 : f32
    %65 = vector.broadcast %cst_28 : f32 to vector<4x32xf32>
    %66 = arith.subf %65, %64 : vector<4x32xf32>
    %67 = arith.mulf %38, %66 : vector<4x32xf32>
    %cst_29 = arith.constant 1.000000e+00 : f32
    %68 = vector.broadcast %cst_29 : f32 to vector<4x32xf32>
    %69 = arith.addf %68, %67 : vector<4x32xf32>
    %70 = arith.mulf %31, %69 : vector<4x32xf32>
    %c0_30 = arith.constant 0 : index
    %c0_31 = arith.constant 0 : index
    %71 = vector.load %arg8[%c0_30, %c0_31] : memref<32x32xf32, #tpu.memory_space<vmem>>, vector<32x32xf32>
    %cst_32 = arith.constant dense<0.000000e+00> : vector<4x32xf32>
    %72 = tpu.matmul %70, %71, %cst_32 {dimension_numbers = #tpu.dot_dimension_numbers<[1], [0], [0], [1], [0, 0, 1, 1], [], []>} : vector<4x32xf32>, vector<32x32xf32>, vector<4x32xf32> -> vector<4x32xf32>
    %c0_33 = arith.constant 0 : index
    %c0_34 = arith.constant 0 : index
    %73 = vector.load %arg9[%c0_33, %c0_34] : memref<1x32xf32, #tpu.memory_space<vmem>>, vector<1x32xf32>
    %74 = vector.broadcast %73 : vector<1x32xf32> to vector<4x32xf32>
    %75 = arith.addf %72, %74 : vector<4x32xf32>
    %76 = arith.negf %75 : vector<4x32xf32>
    %77 = math.exp %76 : vector<4x32xf32>
    %cst_35 = arith.constant 1.000000e+00 : f32
    %78 = vector.broadcast %cst_35 : f32 to vector<4x32xf32>
    %79 = arith.addf %78, %77 : vector<4x32xf32>
    %80 = arith.divf %78, %79 : vector<4x32xf32>
    %81 = vector.shape_cast %80 : vector<4x32xf32> to vector<4x1x32xf32>
    %c0_36 = arith.constant 0 : index
    %c0_37 = arith.constant 0 : index
    %c0_38 = arith.constant 0 : index
    %82 = vector.load %arg2[%c0_36, %c0_37, %c0_38] : memref<4x32x17xf32, #tpu.memory_space<vmem>>, vector<4x32x17xf32>
    %83 = tpu.transpose %82, [0, 2, 1] : vector<4x32x17xf32> -> vector<4x17x32xf32>
    %84 = tpu.iota {dimensions = array<i32: 1>} : vector<1x17x32xi32>
    %c16_i32 = arith.constant 16 : i32
    %85 = vector.broadcast %c16_i32 : i32 to vector<1x17x32xi32>
    %86 = arith.cmpi slt, %84, %85 : vector<1x17x32xi32>
    %cst_39 = arith.constant 0.000000e+00 : f32
    %87 = vector.shape_cast %86 : vector<1x17x32xi1> to vector<1x17x32xi1>
    %88 = vector.broadcast %87 : vector<1x17x32xi1> to vector<4x17x32xi1>
    %89 = vector.broadcast %cst_39 : f32 to vector<4x17x32xf32>
    %90 = arith.select %88, %83, %89 : vector<4x17x32xi1>, vector<4x17x32xf32>
    %91 = vector.extract_strided_slice %90 {offsets = [0, 16, 0], sizes = [4, 1, 32], strides = [1, 1, 1]} : vector<4x17x32xf32> to vector<4x1x32xf32>
    %92 = vector.extract_strided_slice %90 {offsets = [0, 0, 0], sizes = [4, 16, 32], strides = [1, 1, 1]} : vector<4x17x32xf32> to vector<4x16x32xf32>
    %93 = tpu.concatenate %91, %92 in 1 : vector<4x1x32xf32>, vector<4x16x32xf32> -> vector<4x17x32xf32>
    %94 = arith.addf %93, %90 : vector<4x17x32xf32>
    %95 = vector.broadcast %81 : vector<4x1x32xf32> to vector<4x17x32xf32>
    %96 = arith.mulf %95, %94 : vector<4x17x32xf32>
    %c0_40 = arith.constant 0 : index
    %c0_41 = arith.constant 0 : index
    %c0_42 = arith.constant 0 : index
    %97 = vector.load %arg1[%c0_40, %c0_41, %c0_42] : memref<4x17x32xf32, #tpu.memory_space<vmem>>, vector<4x17x32xf32>
    %98 = arith.addf %97, %96 : vector<4x17x32xf32>
    %c0_43 = arith.constant 0 : index
    %c0_44 = arith.constant 0 : index
    %c0_45 = arith.constant 0 : index
    %99 = vector.load %arg10[%c0_43, %c0_44, %c0_45] : memref<4x17x32xf32, #tpu.memory_space<vmem>>, vector<4x17x32xf32>
    tpu.vector_store %arg10[%c0_43, %c0_44, %c0_45], %98 {strides = array<i32>} : memref<4x17x32xf32, #tpu.memory_space<vmem>>, vector<4x17x32xf32>,
    return
  }
  func.func @transform_0(%arg0: i32) -> (i32, i32, i32) {
    %c0_i32 = arith.constant 0 : i32
    %c0_i32_0 = arith.constant 0 : i32
    %c0_i32_1 = arith.constant 0 : i32
    return %arg0, %c0_i32, %c0_i32_0 : i32, i32, i32
  }
  func.func @transform_1(%arg0: i32) -> (i32, i32, i32) {
    %c0_i32 = arith.constant 0 : i32
    %c0_i32_0 = arith.constant 0 : i32
    %c0_i32_1 = arith.constant 0 : i32
    return %arg0, %c0_i32, %c0_i32_0 : i32, i32, i32
  }
  func.func @transform_2(%arg0: i32) -> (i32, i32) {
    %c0_i32 = arith.constant 0 : i32
    %c0_i32_0 = arith.constant 0 : i32
    return %arg0, %c0_i32 : i32, i32
  }
  func.func @transform_3(%arg0: i32) -> (i32, i32) {
    %c0_i32 = arith.constant 0 : i32
    %c0_i32_0 = arith.constant 0 : i32
    %c0_i32_1 = arith.constant 0 : i32
    return %c0_i32, %c0_i32_0 : i32, i32
  }
  func.func @transform_4(%arg0: i32) -> (i32, i32) {
    %c0_i32 = arith.constant 0 : i32
    %c0_i32_0 = arith.constant 0 : i32
    %c0_i32_1 = arith.constant 0 : i32
    return %c0_i32, %c0_i32_0 : i32, i32
  }
  func.func @transform_5(%arg0: i32) -> (i32, i32) {
    %c0_i32 = arith.constant 0 : i32
    %c0_i32_0 = arith.constant 0 : i32
    %c0_i32_1 = arith.constant 0 : i32
    return %c0_i32, %c0_i32_0 : i32, i32
  }
  func.func @transform_6(%arg0: i32) -> (i32, i32) {
    %c0_i32 = arith.constant 0 : i32
    %c0_i32_0 = arith.constant 0 : i32
    %c0_i32_1 = arith.constant 0 : i32
    return %c0_i32, %c0_i32_0 : i32, i32
  }
  func.func @transform_7(%arg0: i32) -> (i32, i32) {
    %c0_i32 = arith.constant 0 : i32
    %c0_i32_0 = arith.constant 0 : i32
    %c0_i32_1 = arith.constant 0 : i32
    return %c0_i32, %c0_i32_0 : i32, i32
  }
  func.func @transform_8(%arg0: i32) -> (i32, i32) {
    %c0_i32 = arith.constant 0 : i32
    %c0_i32_0 = arith.constant 0 : i32
    %c0_i32_1 = arith.constant 0 : i32
    return %c0_i32, %c0_i32_0 : i32, i32
  }
  func.func @transform_9(%arg0: i32) -> (i32, i32, i32) {
    %c0_i32 = arith.constant 0 : i32
    %c0_i32_0 = arith.constant 0 : i32
    %c0_i32_1 = arith.constant 0 : i32
    return %arg0, %c0_i32, %c0_i32_0 : i32, i32, i32
  }
}

</mosaic_0001>

<bundles_post_ra>
// kernel: tpu_custom_call.1
= control target key start
LH: loop header
LB: loop body
LE: loop exit
PB: predicated region body
PF: predicated region fallthrough
CT: control target
= control target key end

     0   :  { %vm33_vm0 = vcmask 257024   ;;  %v648_v7 = vmov 0.0|0.0   ;;  %vm649_vm1 = vmmov 0   ;;  %v650_v11 = vmov 0.0   ;;  %s896_s2 = inlined_call_operand.vmem [shape: f32[4,32], index: 2, kind: input, shape index: {}]   ;;  %s897_s5 = inlined_call_operand.vmem [shape: f32[32,32], index: 5, kind: input, shape index: {}]   ;;  %s898_s3 = inlined_call_operand.vmem [shape: f32[1,32], index: 3, kind: input, shape index: {}]   ;;  %s899_s4 = inlined_call_operand.vmem [shape: f32[1,32], index: 4, kind: input, shape index: {}]   ;;  %s900_s7 = inlined_call_operand.vmem [shape: f32[32,32], index: 7, kind: input, shape index: {}]   ;;  %s901_s1 = inlined_call_operand.vmem [shape: f32[4,32,17], index: 1, kind: input, shape index: {}]   ;;  %s902_s6 = inlined_call_operand.vmem [shape: f32[1,32], index: 6, kind: input, shape index: {}]   ;;  %s903_s8 = inlined_call_operand.vmem [shape: f32[1,32], index: 8, kind: input, shape index: {}]   ;;  %s904_s0 = inlined_call_operand.vmem [shape: f32[4,17,32], index: 0, kind: input, shape index: {}]   ;;  %s905_s9 = inlined_call_operand.vmem [shape: f32[4,17,32], index: 9, kind: output, shape index: {}]  }
   0x1   :  { %v32_v0 = vld [vmem:[%s896_s2] sm:$0xf]  ;;  %621 = vmatprep.subr.bf16.mxu0 %v648_v7  ;;  %v65_v9 = vld [vmem:[%s897_s5 + $0x8] sm:$0xff]  ;;  %v66_v10 = vld [vmem:[%s897_s5 + $0x10] sm:$0xff]  ;;  %607 = vmatprep.mubr.msk.f32.mxu0 %vm649_vm1, %v650_v11  ;;  %vm75_vm2 = vcmask 261120   ;;  %vm468_vm4 = vcmask 1040384  }
   0x2   :  { %v34_v1 = vsel %vm33_vm0, %v32_v0, 0.0  ;;  %v64_v8 = vld [vmem:[%s897_s5] sm:$0xff]  ;;  %v67_v13 = vld [vmem:[%s897_s5 + $0x18] sm:$0xff]  ;;  %627 = vmatprep.subr.bf16.mxu1 %v648_v7  ;;  %618 = vmatprep.mubr.msk.f32.mxu1 %vm649_vm1, %v650_v11  ;;  %v177_v25 = vld [vmem:[%s900_s7 + $0x8] sm:$0xff]  ;;  %vm567_vm5 = vcmask 253952  }
   0x3   :  { %35 = vadd.xlane.f32.xlu0 %v34_v1  ;;  %v622_v12 = vpack.c.bf16 %v65_v9, %v64_v8  ;;  %v625_v14 = vpack.c.bf16 %v67_v13, %v66_v10  ;;  %v582_v19 = vld [vmem:[%s898_s3] ss:$0 sm:$0xff]  ;;  %v178_v27 = vld [vmem:[%s900_s7 + $0x10] sm:$0xff]  ;;  %v179_v28 = vld [vmem:[%s900_s7 + $0x18] sm:$0xff] }
   0x4   :  { %v583_v21 = vld [vmem:[%s899_s4] ss:$0 sm:$0xff]  ;;  %v631_v29 = vpack.c.bf16 %v179_v28, %v178_v27  ;;  %v292_v31 = vld [vmem:[%s901_s1 + $0x8] sm:$0xff]  ;;  %v293_v34 = vld [vmem:[%s901_s1 + $0x10] sm:$0xff] }
   0x5   :  { %623 = vmatpush3.bf16.msra.mxu0 %v622_v12  ;;  %v176_v24 = vld [vmem:[%s900_s7] sm:$0xff]  ;;  %v296_v33 = vld [vmem:[%s901_s1 + $0x28] sm:$0xff]  ;;  %v297_v35 = vld [vmem:[%s901_s1 + $0x30] sm:$0xff] }
   0x6   :  { %624 = vmatprep.subr.bf16.mxu0 %v648_v7  ;;  %v628_v26 = vpack.c.bf16 %v177_v25, %v176_v24  ;;  %v291_v30 = vld [vmem:[%s901_s1] sm:$0xff]  ;;  %v294_v36 = vld [vmem:[%s901_s1 + $0x18] sm:$0xff]  ;;  %v300_v39 = vld [vmem:[%s901_s1 + $0x48] sm:$0xff]  ;;  %v270_v24 = vlaneseq }
   0x7   :  { %307 = vxpose.xlu1.b32.start [1/4] (short) (narrow) %v291_v30, 16  ;;  %v295_v32 = vld [vmem:[%s901_s1 + $0x20] sm:$0xff]  ;;  %v298_v37 = vld [vmem:[%s901_s1 + $0x38] sm:$0xff]  ;;  %v301_v40 = vld [vmem:[%s901_s1 + $0x50] sm:$0xff] }
   0x8   :  { %629 = vmatpush3.bf16.msra.mxu1 %v628_v26  ;;  %v299_v38 = vld [vmem:[%s901_s1 + $0x40] sm:$0xff]  ;;  %v302_v41 = vld [vmem:[%s901_s1 + $0x58] sm:$0xff]  ;;  %v304_v43 = vld [vmem:[%s901_s1 + $0x68] sm:$0xff]  ;;  %v271_v28 = vshrl.u32 %v270_v24, 7 }
   0x9   :  { %626 = vmatpush3.bf16.msra.mxu0 %v625_v14  ;;  %630 = vmatprep.subr.bf16.mxu1 %v648_v7  ;;  %v303_v42 = vld [vmem:[%s901_s1 + $0x60] sm:$0xff]  ;;  %v305_v44 = vld [vmem:[%s901_s1 + $0x70] sm:$0xff]  ;;  %v306_v45 = vld [vmem:[%s901_s1 + $0x78] sm:$0xff] }
   0xa   :  { %v584_v46 = vld [vmem:[%s902_s6] ss:$0 sm:$0xff]  ;;  %v550_v24 = vld [vmem:[%s904_s0 + $0x48] sm:$0xff] }
   0xb   :  { %308 = vxpose.xlu1.b32.cont [2/4] (short) (narrow) %v292_v31, 16  ;;  %v586_v12 = vld [vmem:[%s903_s8] ss:$0 sm:$0xff] }
   0xc   :  { %632 = vmatpush3.bf16.msra.mxu1 %v631_v29 }
   0xf   :  { %309 = vxpose.xlu1.b32.cont [3/4] (short) (narrow) %v293_v34, 16 }
  0x13   :  { %310 = vxpose.xlu1.b32.end [4/4] (short) (narrow) %v294_v36, 16 }
  0x17   :  { %371 = vxpose.xlu1.b32.start [1/4] (short) (narrow) %v299_v38, 16 }
  0x1b   :  { %372 = vxpose.xlu1.b32.cont [2/4] (short) (narrow) %v300_v39, 16 }
  0x1f   :  { %373 = vxpose.xlu1.b32.cont [3/4] (short) (narrow) %v301_v40, 16 }
  0x23   :  { %374 = vxpose.xlu1.b32.end [4/4] (short) (narrow) %v302_v41, 16  ;;  %v511_v41 = vsub.s32 0, %v271_v28 }
  0x27   :  { %403 = vxpose.xlu1.b32.start [1/4] (short) (narrow) %v303_v42, 16 }
  0x2b   :  { %404 = vxpose.xlu1.b32.cont [2/4] (short) (narrow) %v304_v43, 16 }
  0x2f   :  { %405 = vxpose.xlu1.b32.cont [3/4] (short) (narrow) %v305_v44, 16 }
  0x33   :  { %406 = vxpose.xlu1.b32.end [4/4] (short) (narrow) %v306_v45, 16 }
  0x87   :  { %v323_v13 = vpop.trf.xlu1 }
  0x90   :  { %v36_v2 = vpop.xlane.xlu0 %35 }
  0x91   :  { %v38_v3 = vmul.f32 0.03125, %v36_v2 }
  0x93   :  { %v39_v4 = vsub.f32 %v32_v0, %v38_v3 }
  0x95   :  { %v40_v5 = vmul.f32 %v39_v4, %v39_v4 }
  0x97   :  { %v41_v6 = vsel %vm33_vm0, %v40_v5, 0.0 }
  0x98   :  { %42 = vadd.xlane.f32.xlu0 %v41_v6  ;;  %v651_v6 = vmov -1.0  }
  0xc5   :  { %339 = vxpose.xlu0.b32.start [1/4] (short) (narrow) %v295_v32, 16  ;;  %v469_v32 = vrot.slane %v323_v13, 7 }
  0xc7   :  { %v493_v42 = vsel %vm468_vm4, 0.0, %v469_v32 }
  0xc9   :  { %340 = vxpose.xlu0.b32.cont [2/4] (short) (narrow) %v296_v33, 16 }
  0xcd   :  { %341 = vxpose.xlu0.b32.cont [3/4] (short) (narrow) %v297_v35, 16 }
  0xd1   :  { %342 = vxpose.xlu0.b32.end [4/4] (short) (narrow) %v298_v37, 16 }
 0x125   :  { %v43_v15 = vpop.xlane.xlu0 %42 }
 0x126   :  { %v44_v16 = vmul.f32 0.03125, %v43_v15 }
 0x128   :  { %v45_v17 = vadd.f32 1e-05, %v44_v16 }
 0x12a   :  { %638 = vrsqrt.f32 %v45_v17 }
 0x134   :  { %v639_v18 = vpop.eup %638 }
 0x135   :  { %v47_v20 = vmul.f32 %v639_v18, %v39_v4  ;;  %v324_v18 = vpop.trf.xlu1 }
 0x136   :  { %v470_v33 = vrot.slane %v324_v18, 7 }
 0x137   :  { %v55_v22 = vmul.f32 %v582_v19, %v47_v20 }
 0x138   :  { %v471_v43 = vsel %vm468_vm4, %v469_v32, %v470_v33  ;;  %v551_v32 = vld [vmem:[%s904_s0 + $0x50] sm:$0xff] }
 0x139   :  { %v63_v23 = vadd.f32 %v583_v21, %v55_v22  ;;  %v387_v19 = vpop.trf.xlu1  ;;  %v652_v22 = vmov 1966171168  }
 0x13a   :  { %v475_v34 = vrot.slane %v387_v19, 7 }
 0x13b   :  { %608 = vmatmul.mubr.msk.f32.vlgmr.msra.gmra.mrb[0].mxu0 %vm75_vm2, %v63_v23  ;;  %v268_v23 = vunpack.c.l.s4 %v652_v22  ;;  %v546_v22 = vld [vmem:[%s904_s0 + $0x28] sm:$0x1] }
 0x13c   :  { %v495_v45 = vsel %vm468_vm4, 0.0, %v475_v34 }
 0x13d   :  { %v792_v25 = vpop.trf.xlu1  ;;  %v269_v27 = vunpack.c.0.s8 %v268_v23 }
 0x13e   :  { %v476_v35 = vrot.slane %v792_v25, 7 }
 0x13f   :  { %v272_v31 = vsub.s32 %v269_v27, %v271_v28 }
 0x141   :  { %v419_v29 = vpop.trf.xlu1 }
 0x142   :  { %v478_v37 = vrot.slane %v419_v29, 7 }
 0x145   :  { %v355_v26 = vpop.trf.xlu0  ;;  %v800_v44 = vpop.trf.xlu1 }
 0x146   :  { %v472_v36 = vrot.slane %v355_v26, 7 }
 0x149   :  { %v794_v30 = vpop.trf.xlu0 }
 0x14a   :  { %v473_v38 = vrot.slane %v794_v30, 7 }
 0x20e   :  { %v145_v47 = vpop.f32.mrb[0].mxu0 }
 0x20f   :  { %v146_v48 = vadd.f32 %v584_v46, %v145_v47  ;;  %v609_v49 = vpop.f32.mrb[1].mxu0  ;;  %v477_v46 = vsel %vm468_vm4, %v475_v34, %v476_v35  ;;  %v494_v47 = vsel %vm468_vm4, 0.0, %v472_v36 }
 0x211   :  { %v150_v50 = vmul.f32 0.70710677, %v146_v48  ;;  %v149_v9 = vmul.f32 0.5, %v146_v48 }
 0x213   :  { %v153_v51 = vand.u32 2147483647, %v150_v50  ;;  %vm151_vm3 = vcmp.ge.f32.partialorder %v150_v50, 0.0  ;;  %v496_v50 = vsel %vm468_vm4, 0.0, %v478_v37 }
 0x214   :  { %v152_v7 = vsel %vm151_vm3, 1.0, %v651_v6  ;;  %v547_v6 = vld [vmem:[%s904_s0 + $0x30] sm:$0xff] }
 0x215   :  { %v154_v52 = vmul.f32 0.3275911, %v153_v51  ;;  %v167_v54 = vsub.f32 0.0, %v153_v51 }
 0x217   :  { %v155_v53 = vadd.f32 1.0, %v154_v52  ;;  %v168_v56 = vmul.f32 %v167_v54, %v153_v51  ;;  %v474_v51 = vsel %vm468_vm4, %v472_v36, %v473_v38  ;;  %v497_v52 = vadd.f32 %v493_v42, %v323_v13 }
 0x218   :  { %v479_v54 = vrot.slane %v800_v44, 7 }
 0x219   :  { %640 = vrcp.f32 %v155_v53  ;;  %v169_v59 = vmul.f32 1.442695, %v168_v56  ;;  %v498_v53 = vadd.f32 %v471_v43, %v324_v18 }
 0x21b   :  { %642 = vpow2.f32 %v169_v59  ;;  %v541_v59 = vld [vmem:[%s904_s0] sm:$0xff] }
 0x223   :  { %v641_v55 = vpop.eup %640 }
 0x224   :  { %v158_v57 = vmul.f32 1.0614054, %v641_v55 }
 0x225   :  { %v643_v3 = vpop.eup %642 }
 0x226   :  { %v159_v58 = vadd.f32 -1.4531521, %v158_v57  ;;  %v503_v57 = vadd.f32 %v495_v45, %v387_v19 }
 0x228   :  { %v160_v60 = vmul.f32 %v641_v55, %v159_v58 }
 0x22a   :  { %v161_v61 = vadd.f32 1.4214138, %v160_v60  ;;  %v542_v60 = vld [vmem:[%s904_s0 + $0x8] sm:$0xff] }
 0x22c   :  { %v162_v62 = vmul.f32 %v641_v55, %v161_v61  ;;  %v543_v61 = vld [vmem:[%s904_s0 + $0x10] sm:$0x1] }
 0x22e   :  { %v163_v63 = vadd.f32 -0.28449672, %v162_v62  ;;  %v504_v62 = vadd.f32 %v477_v46, %v792_v25 }
 0x230   :  { %v164_v0 = vmul.f32 %v641_v55, %v163_v63  ;;  %v500_v63 = vadd.f32 %v494_v47, %v355_v26 }
 0x232   :  { %v165_v1 = vadd.f32 0.2548296, %v164_v0  ;;  %v506_v0 = vadd.f32 %v496_v50, %v419_v29 }
 0x234   :  { %v166_v2 = vmul.f32 %v641_v55, %v165_v1  ;;  %v501_v1 = vadd.f32 %v474_v51, %v794_v30 }
 0x236   :  { %v171_v4 = vmul.f32 %v643_v3, %v166_v2 }
 0x238   :  { %v172_v5 = vsub.f32 1.0, %v171_v4 }
 0x23a   :  { %v173_v8 = vmul.f32 %v172_v5, %v152_v7 }
 0x23c   :  { %v174_v10 = vadd.f32 1.0, %v173_v8 }
 0x23e   :  { %v175_v11 = vmul.f32 %v174_v10, %v149_v9  ;;  %v480_v9 = vsel %vm468_vm4, %v478_v37, %v479_v54 }
 0x23f   :  { %v507_v27 = vadd.f32 %v480_v9, %v800_v44 }
 0x240   :  { %619 = vmatmul.mubr.msk.f32.vlgmr.msra.gmra.mrb[0].mxu1 %vm75_vm2, %v175_v11 }
 0x313   :  { %v256_v14 = vpop.f32.mrb[0].mxu1 }
 0x314   :  { %v257_v15 = vadd.f32 %v586_v12, %v256_v14  ;;  %v620_v16 = vpop.f32.mrb[1].mxu1  ;;  %v548_v14 = vld [vmem:[%s904_s0 + $0x38] sm:$0xff] }
 0x315   :  { %v544_v16 = vld [vmem:[%s904_s0 + $0x18] sm:$0xff] }
 0x316   :  { %v588_v17 = vmul.f32 -1.442695, %v257_v15  ;;  %v549_v15 = vld [vmem:[%s904_s0 + $0x40] sm:$0x1] }
 0x318   :  { %644 = vpow2.f32 %v588_v17 }
 0x322   :  { %v645_v20 = vpop.eup %644 }
 0x323   :  { %v263_v21 = vadd.f32 1.0, %v645_v20 }
 0x325   :  { %646 = vrcp.f32 %v263_v21  ;;  %v545_v21 = vld [vmem:[%s904_s0 + $0x20] sm:$0xff] }
 0x32f   :  { %v647_v39 = vpop.eup %646 }
 0x330   :  { %v273_v40 = vrot.slane %v647_v39, %v272_v31 }
 0x332   :  { %v281_v48 = vrot.slane %v273_v40, %v272_v31  ;;  %v274_v49 = vcombine.high %v273_v40, %v273_v40 }
 0x334   :  { %v512_v55 = vrot.slane %v281_v48, %v511_v41  ;;  %v289_v56 = vcombine.high %v281_v48, %v281_v48  ;;  %v288_v58 = vrot.slane %v274_v49, %v272_v31 }
 0x336   :  { %v529_v2 = vmul.f32 %v512_v55, %v497_v52  ;;  %v530_v3 = vmul.f32 %v512_v55, %v498_v53  ;;  %v531_v4 = vmul.f32 %v512_v55, %v470_v33  ;;  %v520_v5 = vrot.slane %v289_v56, %v511_v41  ;;  %v552_v33 = vld [vmem:[%s904_s0 + $0x58] sm:$0x1] }
 0x337   :  { %v516_v7 = vrot.slane %v288_v58, %v511_v41  ;;  %v290_v8 = vcombine.high %v288_v58, %v288_v58 }
 0x338   :  { %v553_v10 = vadd.f32 %v541_v59, %v529_v2  ;;  %v554_v11 = vadd.f32 %v542_v60, %v530_v3  ;;  %v555_v12 = vadd.f32 %v543_v61, %v531_v4  ;;  %v535_v13 = vmul.f32 %v520_v5, %v503_v57 }
 0x339   :  { %v536_v17 = vmul.f32 %v520_v5, %v504_v62  ;;  %v537_v18 = vmul.f32 %v520_v5, %v476_v35  ;;  %v532_v19 = vmul.f32 %v516_v7, %v500_v63  ;;  %v524_v20 = vrot.slane %v290_v8, %v511_v41 }
 0x33a   :  { %565 = vst.msk [vmem:[%s905_s9] sm:$0xff] %vm75_vm2, %v553_v10  ;;  %566 = vst.msk [vmem:[%s905_s9 + $0x8] sm:$0xff] %vm75_vm2, %v554_v11  ;;  %v559_v23 = vadd.f32 %v547_v6, %v535_v13  ;;  %v533_v25 = vmul.f32 %v516_v7, %v501_v1  ;;  %v534_v26 = vmul.f32 %v516_v7, %v473_v38 }
 0x33b   :  { %568 = vst.msk [vmem:[%s905_s9 + $0x10] sm:$0x1] %vm567_vm5, %v555_v12  ;;  %v560_v28 = vadd.f32 %v548_v14, %v536_v17  ;;  %v561_v29 = vadd.f32 %v549_v15, %v537_v18  ;;  %v556_v30 = vadd.f32 %v544_v16, %v532_v19  ;;  %v538_v31 = vmul.f32 %v524_v20, %v506_v0 }
 0x33c   :  { %572 = vst.msk [vmem:[%s905_s9 + $0x30] sm:$0xff] %vm75_vm2, %v559_v23  ;;  %v557_v34 = vadd.f32 %v545_v21, %v533_v25  ;;  %v558_v35 = vadd.f32 %v546_v22, %v534_v26  ;;  %v539_v36 = vmul.f32 %v524_v20, %v507_v27  ;;  %v540_v37 = vmul.f32 %v524_v20, %v479_v54 }
 0x33d   :  { %573 = vst.msk [vmem:[%s905_s9 + $0x38] sm:$0xff] %vm75_vm2, %v560_v28  ;;  %569 = vst.msk [vmem:[%s905_s9 + $0x18] sm:$0xff] %vm75_vm2, %v556_v30  ;;  %v562_v38 = vadd.f32 %v550_v24, %v538_v31 }
 0x33e   :  { %574 = vst.msk [vmem:[%s905_s9 + $0x40] sm:$0x1] %vm567_vm5, %v561_v29  ;;  %571 = vst.msk [vmem:[%s905_s9 + $0x28] sm:$0x1] %vm567_vm5, %v558_v35  ;;  %v563_v39 = vadd.f32 %v551_v32, %v539_v36  ;;  %v564_v40 = vadd.f32 %v552_v33, %v540_v37 }
 0x33f   :  { %570 = vst.msk [vmem:[%s905_s9 + $0x20] sm:$0xff] %vm75_vm2, %v557_v34  ;;  %575 = vst.msk [vmem:[%s905_s9 + $0x48] sm:$0xff] %vm75_vm2, %v562_v38 }
 0x340   :  { %576 = vst.msk [vmem:[%s905_s9 + $0x50] sm:$0xff] %vm75_vm2, %v563_v39 }
 0x341   :  { %577 = vst.msk [vmem:[%s905_s9 + $0x58] sm:$0x1] %vm567_vm5, %v564_v40 }

</bundles_post_ra>
